<compile_context>
chip_gen: v6e
topology: v6e:2x2x1
jax: 0.10.0
libtpu: 0.0.40
codegen_flags: <defaults>
</compile_context>

<pallas_src>
import jax
import jax.numpy as jnp
from jax.experimental import pallas as pl
from jax.experimental.pallas import tpu as pltpu

LANE = 128
BATCH_ALIGN = 16   # bf16 output packs 2 rows per sublane -> keep tiles 16-aligned


def _round_up(x, m):
    return ((x + m - 1) // m) * m


def _cdiv(a, b):
    return (a + b - 1) // b


def actor_kernel(x_ref, w1_ref, b1_ref, w2_ref, b2_ref, w3_ref, b3_ref, o_ref):
    # One batch tile per grid step; weights/biases are VMEM-resident (constant
    # index_map), so each step is three back-to-back MXU matmuls + VPU/EUP ops.
    x = x_ref[...].astype(w1_ref.dtype)                               # bf16 into MXU
    h1 = jnp.dot(x, w1_ref[...], preferred_element_type=jnp.float32) + b1_ref[...]
    h1 = jnp.maximum(h1, 0.0).astype(w2_ref.dtype)                    # ReLU, bf16
    h2 = jnp.dot(h1, w2_ref[...], preferred_element_type=jnp.float32) + b2_ref[...]
    h2 = jnp.maximum(h2, 0.0).astype(w3_ref.dtype)                    # ReLU, bf16
    y = jnp.dot(h2, w3_ref[...], preferred_element_type=jnp.float32) + b3_ref[...]
    o_ref[...] = jnp.tanh(y).astype(o_ref.dtype)                      # tanh (EUP), bf16 out


def prepare_actor_params(params, *, weight_dtype=jnp.bfloat16):
    """One-time weight preparation (hoisted out of the hot forward path).

    Pads fc1/fc2/output feature dims to multiples of 128 lanes (zero-filled,
    so padded lanes are mathematically inert) and casts weights to bf16.
    Biases stay f32 and are added to the f32 MXU accumulators.
    """
    w1, b1, w2, b2, w3, b3 = params
    state_size, fc1 = w1.shape
    fc2 = w2.shape[1]
    action_size = w3.shape[1]
    fc1_p = _round_up(fc1, LANE)
    fc2_p = _round_up(fc2, LANE)
    out_p = _round_up(action_size, LANE)

    w1p = jnp.zeros((state_size, fc1_p), weight_dtype).at[:, :fc1].set(w1.astype(weight_dtype))
    b1p = jnp.zeros((1, fc1_p), jnp.float32).at[:, :fc1].set(b1.astype(jnp.float32))
    w2p = jnp.zeros((fc1_p, fc2_p), weight_dtype).at[:fc1, :fc2].set(w2.astype(weight_dtype))
    b2p = jnp.zeros((1, fc2_p), jnp.float32).at[:, :fc2].set(b2.astype(jnp.float32))
    w3p = jnp.zeros((fc2_p, out_p), weight_dtype).at[:fc2, :action_size].set(w3.astype(weight_dtype))
    b3p = jnp.zeros((1, out_p), jnp.float32).at[:, :action_size].set(b3.astype(jnp.float32))
    return (w1p, b1p, w2p, b2p, w3p, b3p), action_size


def actor_forward(state, prepared_params, action_size, *, max_batch_tile=1024):
    """Pallas equivalent of Actor.forward with bn_mode=0.

    `prepared_params` must come from prepare_actor_params (padded bf16 weights).
    """
    if state.ndim == 1:                      # mirrors torch.unsqueeze(state, 0)
        state = state[None, :]
    w1p, b1p, w2p, b2p, w3p, b3p = prepared_params
    batch, state_size = state.shape
    fc1_p = w1p.shape[1]
    fc2_p = w2p.shape[1]
    out_p = w3p.shape[1]

    # --- batch tiling: even split across tiles, minimal padding --------------
    # At least 2 tiles for large batches so both v7x TensorCores get work
    # (harmless extra ~0.35us step on single-TC v5e/v6e).  Tiles capped at
    # max_batch_tile rows so per-step VMEM stays small on every generation.
    min_tiles = 2 if batch > 256 else 1
    n_tiles = max(_cdiv(batch, max_batch_tile), min_tiles)
    bt = _round_up(_cdiv(batch, n_tiles), BATCH_ALIGN)
    batch_pad = bt * n_tiles
    if batch_pad != batch:
        state_p = jnp.zeros((batch_pad, state_size), state.dtype).at[:batch].set(state)
    else:
        state_p = state

    out = pl.pallas_call(
        actor_kernel,
        out_shape=jax.ShapeDtypeStruct((batch_pad, out_p), jnp.bfloat16),
        grid=(n_tiles,),
        in_specs=[
            # activation tile: marches along batch
            pl.BlockSpec((bt, state_size), lambda i: (i, 0)),
            # weights / biases: constant index map -> DMA'd once, VMEM-resident
            pl.BlockSpec((state_size, fc1_p), lambda i: (0, 0)),
            pl.BlockSpec((1, fc1_p), lambda i: (0, 0)),
            pl.BlockSpec((fc1_p, fc2_p), lambda i: (0, 0)),
            pl.BlockSpec((1, fc2_p), lambda i: (0, 0)),
            pl.BlockSpec((fc2_p, out_p), lambda i: (0, 0)),
            pl.BlockSpec((1, out_p), lambda i: (0, 0)),
        ],
        out_specs=pl.BlockSpec((bt, out_p), lambda i: (i, 0)),
        compiler_params=pltpu.CompilerParams(
            dimension_semantics=("parallel",),   # shard batch tiles across TCs on v7x
        ),
    )(state_p, w1p, b1p, w2p, b2p, w3p, b3p)

    return out[:batch, :action_size].astype(jnp.float32)


def init_actor_params(key, state_size, action_size, fc1_units=400, fc2_units=300):
    """Deterministic synthetic init mirroring Actor.reset_parameters.

    hidden_init uses lim = 1/sqrt(weight.size(0)) (== out_features in torch);
    fc3 weights are uniform(-3e-3, 3e-3).  Biases follow torch's default
    Linear init: uniform(-1/sqrt(fan_in), 1/sqrt(fan_in)).
    """
    ks = jax.random.split(key, 6)

    def u(k, shape, lim):
        return jax.random.uniform(k, shape, jnp.float32, minval=-lim, maxval=lim)

    lim1 = 1.0 / jnp.sqrt(fc1_units)   # hidden_init uses weight.size(0) == out
    lim2 = 1.0 / jnp.sqrt(fc2_units)
    w1 = u(ks[0], (state_size, fc1_units), lim1)        # stored as (in, out)
    b1 = u(ks[1], (1, fc1_units), 1.0 / jnp.sqrt(state_size))
    w2 = u(ks[2], (fc1_units, fc2_units), lim2)
    b2 = u(ks[3], (1, fc2_units), 1.0 / jnp.sqrt(fc1_units))
    w3 = u(ks[4], (fc2_units, action_size), 3e-3)
    b3 = u(ks[5], (1, action_size), 1.0 / jnp.sqrt(fc2_units))
    return (w1, b1, w2, b2, w3, b3)


def actor_reference(state, params):
    """Plain-JAX f32 reference for correctness checking."""
    if state.ndim == 1:
        state = state[None, :]
    w1, b1, w2, b2, w3, b3 = params
    x = jnp.maximum(state @ w1 + b1, 0.0)
    x = jnp.maximum(x @ w2 + b2, 0.0)
    return jnp.tanh(x @ w3 + b3)


if __name__ == "__main__":
    # Small, forward-consistent shapes: batch=2 states of size 32, 4 actions.
    batch = 2
    state_size = 32
    action_size = 4
    fc1_units = 400
    fc2_units = 300

    key = jax.random.PRNGKey(0)
    k_params, k_state, k_state2 = jax.random.split(key, 3)
    params = init_actor_params(k_params, state_size, action_size, fc1_units, fc2_units)
    prepared, act_sz = prepare_actor_params(params)   # one-time weight prep
    state = jax.random.normal(k_state, (batch, state_size), jnp.float32)

    out = actor_forward(state, prepared, act_sz)
    out = jax.block_until_ready(out)
    ref = actor_reference(state, params)
    assert out.shape == (batch, action_size)
    # bf16 weights/activations (f32 MXU accumulation) + bf16 output slab:
    # loosen tolerance vs. the all-f32 reference (tanh output is bounded, so
    # absolute tolerance is safe).
    assert jnp.allclose(out, ref, atol=2e-2, rtol=2e-2), "mismatch vs reference (small batch)"

    # 1-D state path (mirrors torch.unsqueeze).
    out1 = jax.block_until_ready(actor_forward(state[0], prepared, act_sz))
    ref1 = actor_reference(state[0], params)
    assert out1.shape == (1, action_size)
    assert jnp.allclose(out1, ref1, atol=2e-2, rtol=2e-2), "mismatch vs reference (1-D state)"

    # Exercise the multi-tile grid + even-split batch padding path.
    big_batch = 1037
    state_big = jax.random.normal(k_state2, (big_batch, state_size), jnp.float32)
    out_big = jax.block_until_ready(actor_forward(state_big, prepared, act_sz))
    ref_big = actor_reference(state_big, params)
    assert out_big.shape == (big_batch, action_size)
    assert jnp.allclose(out_big, ref_big, atol=2e-2, rtol=2e-2), "mismatch vs reference (big batch)"

    print("KERNEL_OK")
</pallas_src>

<mosaic_0001>
module attributes {stable_mosaic.version = 11 : i64} {
  func.func @actor_kernel(%arg0: i32, %arg1: memref<16x32xf32, #tpu.memory_space<vmem>>, %arg2: memref<32x512xbf16, #tpu.memory_space<vmem>>, %arg3: memref<1x512xf32, #tpu.memory_space<vmem>>, %arg4: memref<512x384xbf16, #tpu.memory_space<vmem>>, %arg5: memref<1x384xf32, #tpu.memory_space<vmem>>, %arg6: memref<384x128xbf16, #tpu.memory_space<vmem>>, %arg7: memref<1x128xf32, #tpu.memory_space<vmem>>, %arg8: memref<16x128xbf16, #tpu.memory_space<vmem>>) attributes {dimension_semantics = [#tpu.dimension_semantics<parallel>], iteration_bounds = array<i64: 1>, scalar_prefetch = 0 : i64, scratch_operands = 0 : i64, tpu.core_type = #tpu.core_type<tc>, window_params = [{transform_indices = @transform_0, window_bounds = array<i64: 16, 32>}, {pipeline_mode = #tpu.pipeline_mode<synchronous>, transform_indices = @transform_1, window_bounds = array<i64: 32, 512>}, {pipeline_mode = #tpu.pipeline_mode<synchronous>, transform_indices = @transform_2, window_bounds = array<i64: 1, 512>}, {pipeline_mode = #tpu.pipeline_mode<synchronous>, transform_indices = @transform_3, window_bounds = array<i64: 512, 384>}, {pipeline_mode = #tpu.pipeline_mode<synchronous>, transform_indices = @transform_4, window_bounds = array<i64: 1, 384>}, {pipeline_mode = #tpu.pipeline_mode<synchronous>, transform_indices = @transform_5, window_bounds = array<i64: 384, 128>}, {pipeline_mode = #tpu.pipeline_mode<synchronous>, transform_indices = @transform_6, window_bounds = array<i64: 1, 128>}, {transform_indices = @transform_7, window_bounds = array<i64: 16, 128>}]} {
    %c0 = arith.constant 0 : index
    %c0_0 = arith.constant 0 : index
    %0 = vector.load %arg1[%c0, %c0_0] : memref<16x32xf32, #tpu.memory_space<vmem>>, vector<16x32xf32>
    %1 = arith.truncf %0 : vector<16x32xf32> to vector<16x32xbf16>
    %c0_1 = arith.constant 0 : index
    %c0_2 = arith.constant 0 : index
    %2 = vector.load %arg2[%c0_1, %c0_2] : memref<32x512xbf16, #tpu.memory_space<vmem>>, vector<32x512xbf16>
    %cst = arith.constant dense<0.000000e+00> : vector<16x512xf32>
    %3 = tpu.matmul %1, %2, %cst {dimension_numbers = #tpu.dot_dimension_numbers<[1], [0], [0], [1], [0, 0, 1, 1], [], []>} : vector<16x32xbf16>, vector<32x512xbf16>, vector<16x512xf32> -> vector<16x512xf32>
    %c0_3 = arith.constant 0 : index
    %c0_4 = arith.constant 0 : index
    %4 = vector.load %arg3[%c0_3, %c0_4] : memref<1x512xf32, #tpu.memory_space<vmem>>, vector<1x512xf32>
    %5 = vector.broadcast %4 : vector<1x512xf32> to vector<16x512xf32>
    %6 = arith.addf %3, %5 : vector<16x512xf32>
    %cst_5 = arith.constant 0.000000e+00 : f32
    %7 = vector.broadcast %cst_5 : f32 to vector<16x512xf32>
    %8 = arith.maximumf %6, %7 : vector<16x512xf32>
    %9 = arith.truncf %8 : vector<16x512xf32> to vector<16x512xbf16>
    %c0_6 = arith.constant 0 : index
    %c0_7 = arith.constant 0 : index
    %10 = vector.load %arg4[%c0_6, %c0_7] : memref<512x384xbf16, #tpu.memory_space<vmem>>, vector<512x384xbf16>
    %cst_8 = arith.constant dense<0.000000e+00> : vector<16x384xf32>
    %11 = tpu.matmul %9, %10, %cst_8 {dimension_numbers = #tpu.dot_dimension_numbers<[1], [0], [0], [1], [0, 0, 1, 1], [], []>} : vector<16x512xbf16>, vector<512x384xbf16>, vector<16x384xf32> -> vector<16x384xf32>
    %c0_9 = arith.constant 0 : index
    %c0_10 = arith.constant 0 : index
    %12 = vector.load %arg5[%c0_9, %c0_10] : memref<1x384xf32, #tpu.memory_space<vmem>>, vector<1x384xf32>
    %13 = vector.broadcast %12 : vector<1x384xf32> to vector<16x384xf32>
    %14 = arith.addf %11, %13 : vector<16x384xf32>
    %cst_11 = arith.constant 0.000000e+00 : f32
    %15 = vector.broadcast %cst_11 : f32 to vector<16x384xf32>
    %16 = arith.maximumf %14, %15 : vector<16x384xf32>
    %17 = arith.truncf %16 : vector<16x384xf32> to vector<16x384xbf16>
    %c0_12 = arith.constant 0 : index
    %c0_13 = arith.constant 0 : index
    %18 = vector.load %arg6[%c0_12, %c0_13] : memref<384x128xbf16, #tpu.memory_space<vmem>>, vector<384x128xbf16>
    %cst_14 = arith.constant dense<0.000000e+00> : vector<16x128xf32>
    %19 = tpu.matmul %17, %18, %cst_14 {dimension_numbers = #tpu.dot_dimension_numbers<[1], [0], [0], [1], [0, 0, 1, 1], [], []>} : vector<16x384xbf16>, vector<384x128xbf16>, vector<16x128xf32> -> vector<16x128xf32>
    %c0_15 = arith.constant 0 : index
    %c0_16 = arith.constant 0 : index
    %20 = vector.load %arg7[%c0_15, %c0_16] : memref<1x128xf32, #tpu.memory_space<vmem>>, vector<1x128xf32>
    %21 = vector.broadcast %20 : vector<1x128xf32> to vector<16x128xf32>
    %22 = arith.addf %19, %21 : vector<16x128xf32>
    %23 = math.tanh %22 : vector<16x128xf32>
    %24 = arith.truncf %23 : vector<16x128xf32> to vector<16x128xbf16>
    %c0_17 = arith.constant 0 : index
    %c0_18 = arith.constant 0 : index
    %25 = vector.load %arg8[%c0_17, %c0_18] : memref<16x128xbf16, #tpu.memory_space<vmem>>, vector<16x128xbf16>
    tpu.vector_store %arg8[%c0_17, %c0_18], %24 {strides = array<i32>} : memref<16x128xbf16, #tpu.memory_space<vmem>>, vector<16x128xbf16>,
    return
  }
  func.func @transform_0(%arg0: i32) -> (i32, i32) {
    %c0_i32 = arith.constant 0 : i32
    %c0_i32_0 = arith.constant 0 : i32
    return %arg0, %c0_i32 : i32, i32
  }
  func.func @transform_1(%arg0: i32) -> (i32, i32) {
    %c0_i32 = arith.constant 0 : i32
    %c0_i32_0 = arith.constant 0 : i32
    %c0_i32_1 = arith.constant 0 : i32
    return %c0_i32, %c0_i32_0 : i32, i32
  }
  func.func @transform_2(%arg0: i32) -> (i32, i32) {
    %c0_i32 = arith.constant 0 : i32
    %c0_i32_0 = arith.constant 0 : i32
    %c0_i32_1 = arith.constant 0 : i32
    return %c0_i32, %c0_i32_0 : i32, i32
  }
  func.func @transform_3(%arg0: i32) -> (i32, i32) {
    %c0_i32 = arith.constant 0 : i32
    %c0_i32_0 = arith.constant 0 : i32
    %c0_i32_1 = arith.constant 0 : i32
    return %c0_i32, %c0_i32_0 : i32, i32
  }
  func.func @transform_4(%arg0: i32) -> (i32, i32) {
    %c0_i32 = arith.constant 0 : i32
    %c0_i32_0 = arith.constant 0 : i32
    %c0_i32_1 = arith.constant 0 : i32
    return %c0_i32, %c0_i32_0 : i32, i32
  }
  func.func @transform_5(%arg0: i32) -> (i32, i32) {
    %c0_i32 = arith.constant 0 : i32
    %c0_i32_0 = arith.constant 0 : i32
    %c0_i32_1 = arith.constant 0 : i32
    return %c0_i32, %c0_i32_0 : i32, i32
  }
  func.func @transform_6(%arg0: i32) -> (i32, i32) {
    %c0_i32 = arith.constant 0 : i32
    %c0_i32_0 = arith.constant 0 : i32
    %c0_i32_1 = arith.constant 0 : i32
    return %c0_i32, %c0_i32_0 : i32, i32
  }
  func.func @transform_7(%arg0: i32) -> (i32, i32) {
    %c0_i32 = arith.constant 0 : i32
    %c0_i32_0 = arith.constant 0 : i32
    return %arg0, %c0_i32 : i32, i32
  }
}

</mosaic_0001>

<bundles_post_ra>
// kernel: tpu_custom_call.1
= control target key start
LH: loop header
LB: loop body
LE: loop exit
PB: predicated region body
PF: predicated region fallthrough
CT: control target
= control target key end

     0   :  { %12 = vsyncpa [#allocation3], 0  ;;  %s2076_s0 = inlined_call_operand.hbm [shape: f32[16,32], index: 0, kind: input, shape index: {}]   ;;  %s2077_s1 = inlined_call_operand.hbm [shape: bf16[32,512], index: 1, kind: input, shape index: {}]   ;;  %s2078_s2 = inlined_call_operand.hbm [shape: f32[1,512], index: 2, kind: input, shape index: {}]   ;;  %s2079_s3 = inlined_call_operand.hbm [shape: bf16[512,384], index: 3, kind: input, shape index: {}]   ;;  %s2080_s4 = inlined_call_operand.vmem [shape: f32[1,384], index: 4, kind: input, shape index: {}]   ;;  %s2081_s5 = inlined_call_operand.hbm [shape: bf16[384,128], index: 5, kind: input, shape index: {}]   ;;  %s2082_s6 = inlined_call_operand.vmem [shape: f32[1,128], index: 6, kind: input, shape index: {}]   ;;  %s2083_s7 = inlined_call_operand.hbm [shape: bf16[16,128], index: 7, kind: output, shape index: {}]  }
   0x1   :  { %13 = vsyncpa [#allocation6], 0 }
   0x2   :  { %14 = vsyncpa [#allocation9], 0 }
   0x3   :  { %15 = vsyncpa [#allocation4], 0  ;;  %s1963_s24 = smov [#allocation5]  }
   0x4   :  { %s33_s25 = sshll.u32 %s1963_s24, 4  ;;  %s34_s25 = int_to_ptr.vmem [resolvable:$true] %s33_s25 }
   0x5   :  { %s1843_s26 = scalar_lea.vmem %s34_s25, 1024  ;;  %p1848_p1 = scmp.lt.s32.totalorder %s34_s25, %s34_s25 }
   0x6   :  { %p1844_p0 = scmp.ne.s32.totalorder %s34_s25, %s1843_s26  ;;  %p1849_p2 = scmp.lt.s32.totalorder %s1843_s26, %s1843_s26 }
   0x8   :  { %p1850_p3 = por %p1849_p2, %p1848_p1 }
   0xa   :  { %p1851_p4 = pnand %p1850_p3, %p1844_p0 }
   0xc   :  { %1854 = shalt.err (!%p1851_p4)
}
   0xd   :  { %s1964_s27 = smov 256   ;;  %s1965_s28 = smov 16  }
   0xe   :  { %39 = dma.hbm_to_vmem [thread:$0]  %s2077_s1, 1024, %s34_s25, [#allocation6], %s1964_s27, %s1964_s27, %s1965_s28  }
   0xf   :  { %s1966_s8 = smov [#allocation8]  }
  0x10   :  { %s55_s9 = sshll.u32 %s1966_s8, 4  ;;  %s56_s9 = int_to_ptr.vmem [resolvable:$true] %s55_s9 }
  0x11   :  { %s1863_s10 = scalar_lea.vmem %s56_s9, 12288  ;;  %p1868_p6 = scmp.lt.s32.totalorder %s56_s9, %s56_s9 }
  0x12   :  { %p1864_p5 = scmp.ne.s32.totalorder %s56_s9, %s1863_s10  ;;  %p1869_p7 = scmp.lt.s32.totalorder %s1863_s10, %s1863_s10 }
  0x14   :  { %p1870_p8 = por %p1869_p7, %p1868_p6 }
  0x16   :  { %p1871_p9 = pnand %p1870_p8, %p1864_p5 }
  0x18   :  { %1874 = shalt.err (!%p1871_p9)
}
  0x19   :  { %s1967_s11 = smov 192   ;;  %s1968_s12 = smov 12  }
  0x1a   :  { %61 = dma.hbm_to_vmem [thread:$0]  %s2079_s3, 12288, %s56_s9, [#allocation9], %s1967_s11, %s1967_s11, %s1968_s12  }
  0x1b   :  { %s1969_s15 = smov [#allocation2]  }
  0x1c   :  { %s21_s16 = sshll.u32 %s1969_s15, 4  ;;  %s22_s16 = int_to_ptr.vmem [resolvable:$true] %s21_s16 }
  0x1d   :  { %s1883_s1 = scalar_lea.vmem %s22_s16, 256  ;;  %p1888_p11 = scmp.lt.s32.totalorder %s22_s16, %s22_s16 }
  0x1e   :  { %p1884_p10 = scmp.ne.s32.totalorder %s22_s16, %s1883_s1  ;;  %p1889_p12 = scmp.lt.s32.totalorder %s1883_s1, %s1883_s1 }
  0x20   :  { %p1890_p13 = por %p1889_p12, %p1888_p11 }
  0x22   :  { %p1891_p0 = pnand %p1890_p13, %p1884_p10 }
  0x24   :  { %1894 = shalt.err (!%p1891_p0)
}
  0x25   :  { %s1970_s17 = smov 128   ;;  %s1971_s18 = smov 8  }
  0x26   :  { %27 = dma.hbm_to_vmem [thread:$0]  %s2076_s0, 256, %s22_s16, [#allocation3], %s1970_s17, %s1970_s17, %s1971_s18  }
  0x27   :  { %s1972_s21 = smov [#allocation7]   ;;  %s1973_s3 = smov [#allocation10]  }
  0x28   :  { %s46_s22 = sshll.u32 %s1972_s21, 4  ;;  %s69_s23 = sshll.u32 %s1973_s3, 4  ;;  %s47_s22 = int_to_ptr.vmem [resolvable:$true] %s46_s22  ;;  %s70_s23 = int_to_ptr.vmem [resolvable:$true] %s69_s23 }
  0x29   :  { %s1903_s24 = scalar_lea.vmem %s47_s22, 64  ;;  %p1908_p2 = scmp.lt.s32.totalorder %s47_s22, %s47_s22 }
  0x2a   :  { %p1904_p1 = scmp.ne.s32.totalorder %s47_s22, %s1903_s24  ;;  %p1909_p3 = scmp.lt.s32.totalorder %s1903_s24, %s1903_s24 }
  0x2c   :  { %p1910_p4 = por %p1909_p3, %p1908_p2 }
  0x2e   :  { %p1911_p5 = pnand %p1910_p4, %p1904_p1 }
  0x30   :  { %1914 = shalt.err (!%p1911_p5)
}
  0x31   :  { %49 = dma.hbm_to_vmem [thread:$0]  %s2078_s2, 64, %s47_s22, [#allocation6]  }
  0x32   :  { %s1923_s27 = scalar_lea.vmem %s70_s23, 3072  ;;  %p1928_p7 = scmp.lt.s32.totalorder %s70_s23, %s70_s23 }
  0x33   :  { %p1924_p6 = scmp.ne.s32.totalorder %s70_s23, %s1923_s27  ;;  %p1929_p8 = scmp.lt.s32.totalorder %s1923_s27, %s1923_s27 }
  0x35   :  { %p1930_p9 = por %p1929_p8, %p1928_p7 }
  0x37   :  { %p1931_p10 = pnand %p1930_p9, %p1924_p6 }
  0x39   :  { %1934 = shalt.err (!%p1931_p10)
}
  0x3a   :  { %s1974_s0 = smov 64   ;;  %s1975_s28 = smov 4  }
  0x3b   :  { %75 = dma.hbm_to_vmem [thread:$0]  %s2081_s5, 3072, %s70_s23, [#allocation9], %s1974_s0, %s1974_s0, %s1975_s28  }
  0x3c   :  { %1955 = dma.done.wait [#allocation3], 256  }
  0x3d   :  { %1956 = vsyncadd [#allocation3], 4294967040 }
  0x3e   :  { %1957 = dma.done.wait [#allocation6], 1088  }
  0x3f   :  { %1958 = vsyncadd [#allocation6], 4294966208 }
  0x40   :  { %1959 = dma.done.wait [#allocation9], 15360  }
  0x41   :  { %1960 = vsyncadd [#allocation9], 4294951936  ;;  %v1976_v0 = vmov 0   ;;  %v1667_v1 = vld [vmem:[#allocation5 + $0x24] ss:$16 sps:$4 sm:$0xff]   ;;  %v95_v10 = vld [vmem:[#allocation2 + $0x8] sm:$0xff] }
  0x42   :  { %203 = vmatprep.mubr.bf16.mxu0 %v1976_v0  ;;  %246 = vmatprep.mubr.bf16.mxu1 %v1976_v0  ;;  %v1669_v2 = vld [vmem:[#allocation5 + $0x2c] ss:$16 sps:$4 sm:$0xff]   ;;  %v1671_v3 = vld [vmem:[#allocation5 + $0x20] ss:$16 sps:$4 sm:$0xff]   ;;  %v1672_v4 = vld [vmem:[#allocation5 + $0x28] ss:$16 sps:$4 sm:$0xff]  }
  0x43   :  { %183 = vmatprep.subr.bf16.mxu0 %v1667_v1  ;;  %226 = vmatprep.subr.bf16.mxu1 %v1669_v2  ;;  %v1673_v5 = vld [vmem:[#allocation5 + $0x4] ss:$16 sps:$4 sm:$0xff]   ;;  %v1675_v6 = vld [vmem:[#allocation5 + $0xc] ss:$16 sps:$4 sm:$0xff]   ;;  %v1677_v7 = vld [vmem:[#allocation5] ss:$16 sps:$4 sm:$0xff]  }
  0x44   :  { %184 = vmatpush1.bf16.msra.mxu0 %v1671_v3  ;;  %227 = vmatpush1.bf16.msra.mxu1 %v1672_v4  ;;  %v1678_v8 = vld [vmem:[#allocation5 + $0x8] ss:$16 sps:$4 sm:$0xff]   ;;  %v94_v9 = vld [vmem:[#allocation2] sm:$0xff]  ;;  %vm167_vm0 = vcmask 261120   ;;  %v1693_v20 = vld [vmem:[#allocation8 + $0x7c] ss:$12 sps:$4 sm:$0xff]  }
  0x45   :  { %185 = vmatprep.subr.bf16.mxu0 %v1673_v5  ;;  %228 = vmatprep.subr.bf16.mxu1 %v1675_v6  ;;  %v1679_v11 = vld [vmem:[#allocation8 + $0xa8] ss:$12 sps:$4 sm:$0xff]   ;;  %v96_v12 = vpack.c.bf16 %v95_v10, %v94_v9  ;;  %v1681_v13 = vld [vmem:[#allocation8 + $0xac] ss:$12 sps:$4 sm:$0xff]   ;;  %v1685_v18 = vld [vmem:[#allocation8 + $0x90] ss:$12 sps:$4 sm:$0xff]  }
  0x46   :  { %v1682_v14 = vld [vmem:[#allocation8 + $0x228] ss:$12 sps:$4 sm:$0xff]   ;;  %v1684_v15 = vld [vmem:[#allocation8 + $0x22c] ss:$12 sps:$4 sm:$0xff]   ;;  %v1688_v19 = vld [vmem:[#allocation8 + $0x210] ss:$12 sps:$4 sm:$0xff]  }
  0x47   :  { %v1687_v16 = vld [vmem:[#allocation8 + $0x94] ss:$12 sps:$4 sm:$0xff]   ;;  %v1696_v21 = vld [vmem:[#allocation8 + $0x1fc] ss:$12 sps:$4 sm:$0xff]   ;;  %v1691_v22 = vld [vmem:[#allocation8 + $0x78] ss:$12 sps:$4 sm:$0xff]  }
  0x48   :  { %186 = vmatpush1.bf16.msra.mxu0 %v1677_v7  ;;  %229 = vmatpush1.bf16.msra.mxu1 %v1678_v8  ;;  %v1690_v17 = vld [vmem:[#allocation8 + $0x214] ss:$12 sps:$4 sm:$0xff]   ;;  %v1694_v23 = vld [vmem:[#allocation8 + $0x1f8] ss:$12 sps:$4 sm:$0xff]   ;;  %v1709_v34 = vld [vmem:[#allocation8 + $0x30] ss:$12 sps:$4 sm:$0xff]  }
  0x49   :  { %926 = vmatprep.subr.bf16.mxu0 %v1681_v13  ;;  %969 = vmatprep.subr.bf16.mxu1 %v1684_v15  ;;  %v1699_v24 = vld [vmem:[#allocation8 + $0x64] ss:$12 sps:$4 sm:$0xff]   ;;  %v1697_v26 = vld [vmem:[#allocation8 + $0x60] ss:$12 sps:$4 sm:$0xff]   ;;  %v1703_v30 = vld [vmem:[#allocation8 + $0x48] ss:$12 sps:$4 sm:$0xff]  }
  0x4a   :  { %v1702_v25 = vld [vmem:[#allocation8 + $0x1e4] ss:$12 sps:$4 sm:$0xff]   ;;  %v1700_v27 = vld [vmem:[#allocation8 + $0x1e0] ss:$12 sps:$4 sm:$0xff]   ;;  %v1706_v31 = vld [vmem:[#allocation8 + $0x1c8] ss:$12 sps:$4 sm:$0xff]  }
  0x4b   :  { %1423 = vmatmul.mubr.msk.bf16.vlgmr.msra.gmra.mxu0 %vm167_vm0, %v96_v12  ;;  %1424 = vmatmul.mubr.msk.bf16.vlgmr.msra.gmra.mxu1 %vm167_vm0, %v96_v12  ;;  %v1705_v28 = vld [vmem:[#allocation8 + $0x4c] ss:$12 sps:$4 sm:$0xff]   ;;  %v1711_v32 = vld [vmem:[#allocation8 + $0x34] ss:$12 sps:$4 sm:$0xff]   ;;  %v1712_v35 = vld [vmem:[#allocation8 + $0x1b0] ss:$12 sps:$4 sm:$0xff]  }
  0x4c   :  { %927 = vmatpush1.bf16.msra.mxu0 %v1679_v11  ;;  %970 = vmatpush1.bf16.msra.mxu1 %v1682_v14  ;;  %v1708_v29 = vld [vmem:[#allocation8 + $0x1cc] ss:$12 sps:$4 sm:$0xff]   ;;  %v1714_v33 = vld [vmem:[#allocation8 + $0x1b4] ss:$12 sps:$4 sm:$0xff]   ;;  %v1717_v36 = vld [vmem:[#allocation8 + $0x1c] ss:$12 sps:$4 sm:$0xff]   ;;  %v107_v14 = vlaneseq }
  0x4d   :  { %928 = vmatprep.subr.bf16.mxu0 %v1687_v16  ;;  %971 = vmatprep.subr.bf16.mxu1 %v1690_v17  ;;  %v1720_v37 = vld [vmem:[#allocation8 + $0x19c] ss:$12 sps:$4 sm:$0xff]   ;;  %v1715_v38 = vld [vmem:[#allocation8 + $0x18] ss:$12 sps:$4 sm:$0xff]   ;;  %v1721_v42 = vld [vmem:[#allocation8] ss:$12 sps:$4 sm:$0xff]  }
  0x4e   :  { %v1718_v39 = vld [vmem:[#allocation8 + $0x198] ss:$12 sps:$4 sm:$0xff]   ;;  %v1724_v43 = vld [vmem:[#allocation8 + $0x180] ss:$12 sps:$4 sm:$0xff]   ;;  %v1727_v46 = vld [vmem:[#allocation8 + $0x168] ss:$12 sps:$4 sm:$0xff]  }
  0x4f   :  { %v1723_v40 = vld [vmem:[#allocation8 + $0x4] ss:$12 sps:$4 sm:$0xff]   ;;  %v1729_v44 = vld [vmem:[#allocation8 + $0x16c] ss:$12 sps:$4 sm:$0xff]   ;;  %v1730_v47 = vld [vmem:[#allocation8 + $0x2e8] ss:$12 sps:$4 sm:$0xff]  }
  0x50   :  { %929 = vmatpush1.bf16.msra.mxu0 %v1685_v18  ;;  %972 = vmatpush1.bf16.msra.mxu1 %v1688_v19  ;;  %v1726_v41 = vld [vmem:[#allocation8 + $0x184] ss:$12 sps:$4 sm:$0xff]   ;;  %v1732_v45 = vld [vmem:[#allocation8 + $0x2ec] ss:$12 sps:$4 sm:$0xff]   ;;  %v1735_v48 = vld [vmem:[#allocation8 + $0x154] ss:$12 sps:$4 sm:$0xff]  }
  0x51   :  { %930 = vmatprep.subr.bf16.mxu0 %v1693_v20  ;;  %973 = vmatprep.subr.bf16.mxu1 %v1696_v21  ;;  %v1738_v49 = vld [vmem:[#allocation8 + $0x2d4] ss:$12 sps:$4 sm:$0xff]   ;;  %v1733_v50 = vld [vmem:[#allocation8 + $0x150] ss:$12 sps:$4 sm:$0xff]   ;;  %v1739_v54 = vld [vmem:[#allocation8 + $0x138] ss:$12 sps:$4 sm:$0xff]  }
  0x52   :  { %v1736_v51 = vld [vmem:[#allocation8 + $0x2d0] ss:$12 sps:$4 sm:$0xff]   ;;  %v1742_v55 = vld [vmem:[#allocation8 + $0x2b8] ss:$12 sps:$4 sm:$0xff]   ;;  %v1745_v58 = vld [vmem:[#allocation8 + $0x120] ss:$12 sps:$4 sm:$0xff]  }
  0x53   :  { %v1741_v52 = vld [vmem:[#allocation8 + $0x13c] ss:$12 sps:$4 sm:$0xff]   ;;  %v1747_v56 = vld [vmem:[#allocation8 + $0x124] ss:$12 sps:$4 sm:$0xff]   ;;  %v1748_v59 = vld [vmem:[#allocation8 + $0x2a0] ss:$12 sps:$4 sm:$0xff]  }
  0x54   :  { %931 = vmatpush1.bf16.msra.mxu0 %v1691_v22  ;;  %974 = vmatpush1.bf16.msra.mxu1 %v1694_v23  ;;  %v1744_v53 = vld [vmem:[#allocation8 + $0x2bc] ss:$12 sps:$4 sm:$0xff]   ;;  %v1750_v57 = vld [vmem:[#allocation8 + $0x2a4] ss:$12 sps:$4 sm:$0xff]   ;;  %v1753_v60 = vld [vmem:[#allocation8 + $0x10c] ss:$12 sps:$4 sm:$0xff]  }
  0x55   :  { %932 = vmatprep.subr.bf16.mxu0 %v1699_v24  ;;  %975 = vmatprep.subr.bf16.mxu1 %v1702_v25  ;;  %v1756_v61 = vld [vmem:[#allocation8 + $0x28c] ss:$12 sps:$4 sm:$0xff]   ;;  %v1751_v62 = vld [vmem:[#allocation8 + $0x108] ss:$12 sps:$4 sm:$0xff]   ;;  %v1757_v2 = vld [vmem:[#allocation8 + $0xf0] ss:$12 sps:$4 sm:$0xff]  }
  0x56   :  { %v1754_v63 = vld [vmem:[#allocation8 + $0x288] ss:$12 sps:$4 sm:$0xff]   ;;  %v1760_v3 = vld [vmem:[#allocation8 + $0x270] ss:$12 sps:$4 sm:$0xff]   ;;  %v1763_v6 = vld [vmem:[#allocation8 + $0xd8] ss:$12 sps:$4 sm:$0xff]  }
  0x57   :  { %v1759_v0 = vld [vmem:[#allocation8 + $0xf4] ss:$12 sps:$4 sm:$0xff]   ;;  %v1765_v4 = vld [vmem:[#allocation8 + $0xdc] ss:$12 sps:$4 sm:$0xff]   ;;  %v1766_v7 = vld [vmem:[#allocation8 + $0x258] ss:$12 sps:$4 sm:$0xff]  }
  0x58   :  { %933 = vmatpush1.bf16.msra.mxu0 %v1697_v26  ;;  %976 = vmatpush1.bf16.msra.mxu1 %v1700_v27  ;;  %v1762_v1 = vld [vmem:[#allocation8 + $0x274] ss:$12 sps:$4 sm:$0xff]   ;;  %v1768_v5 = vld [vmem:[#allocation8 + $0x25c] ss:$12 sps:$4 sm:$0xff]   ;;  %v1771_v8 = vld [vmem:[#allocation8 + $0xc4] ss:$12 sps:$4 sm:$0xff]  }
  0x59   :  { %934 = vmatprep.subr.bf16.mxu0 %v1705_v28  ;;  %977 = vmatprep.subr.bf16.mxu1 %v1708_v29  ;;  %v1774_v9 = vld [vmem:[#allocation8 + $0x244] ss:$12 sps:$4 sm:$0xff]   ;;  %v1769_v10 = vld [vmem:[#allocation8 + $0xc0] ss:$12 sps:$4 sm:$0xff]   ;;  %v2038_v15 = vshrl.u32 %v107_v14, 7  ;;  %vm1978_vm1 = vmmov 0  }
  0x5a   :  { %v1772_v11 = vld [vmem:[#allocation8 + $0x240] ss:$12 sps:$4 sm:$0xff]   ;;  %v1775_v12 = vld [vmem:[#allocation8 + $0x170] ss:$12 sps:$4 sm:$0xff]   ;;  %s1979_s9 = smov [#allocation11]  }
  0x5b   :  { %v1776_v13 = vld [vmem:[#allocation8 + $0x2f0] ss:$12 sps:$4 sm:$0xff]   ;;  %v113_v16 = vsub.s32 1, %v2038_v15  ;;  %v121_v17 = vsub.s32 3, %v2038_v15  ;;  %v109_v18 = vsub.s32 0, %v2038_v15  ;;  %v117_v19 = vsub.s32 2, %v2038_v15 }
  0x5c   :  { %935 = vmatpush1.bf16.msra.mxu0 %v1703_v30  ;;  %978 = vmatpush1.bf16.msra.mxu1 %v1706_v31  ;;  %v105_v20 = vld [vmem:[#allocation7] sm:$0xf]  ;;  %v1802_v14 = vld [vmem:[#allocation8 + $0x1a0] ss:$12 sps:$4 sm:$0xff]   ;;  %s1401_s10 = sshll.u32 %s1979_s9, 4  ;;  %s1402_s10 = int_to_ptr.vmem [resolvable:$true] %s1401_s10 }
  0x5d   :  { %936 = vmatprep.subr.bf16.mxu0 %v1711_v32  ;;  %979 = vmatprep.subr.bf16.mxu1 %v1714_v33  ;;  %v114_v23 = vrot.slane %v105_v20, %v113_v16  ;;  %v122_v24 = vrot.slane %v105_v20, %v121_v17  ;;  %v110_v25 = vrot.slane %v105_v20, %v109_v18  ;;  %v1803_v17 = vld [vmem:[#allocation8 + $0xc8] ss:$12 sps:$4 sm:$0xff]   ;;  %s1935_s11 = scalar_lea.vmem %s1402_s10, 128  ;;  %p1940_p12 = scmp.lt.s32.totalorder %s1402_s10, %s1402_s10 }
  0x5e   :  { %v118_v26 = vrot.slane %v105_v20, %v117_v19  ;;  %v1804_v20 = vld [vmem:[#allocation8 + $0x248] ss:$12 sps:$4 sm:$0xff]   ;;  %p1936_p11 = scmp.ne.s32.totalorder %s1402_s10, %s1935_s11  ;;  %p1941_p13 = scmp.lt.s32.totalorder %s1935_s11, %s1935_s11 }
  0x60   :  { %937 = vmatpush1.bf16.msra.mxu0 %v1709_v34  ;;  %980 = vmatpush1.bf16.msra.mxu1 %v1712_v35  ;;  %p1942_p0 = por %p1941_p13, %p1940_p12 }
  0x61   :  { %938 = vmatprep.subr.bf16.mxu0 %v1717_v36  ;;  %981 = vmatprep.subr.bf16.mxu1 %v1720_v37 }
  0x62   :  { %p1943_p1 = pnand %p1942_p0, %p1936_p11 }
  0x64   :  { %939 = vmatpush1.bf16.msra.mxu0 %v1715_v38  ;;  %982 = vmatpush1.bf16.msra.mxu1 %v1718_v39 }
  0x65   :  { %940 = vmatprep.subr.bf16.mxu0 %v1723_v40  ;;  %983 = vmatprep.subr.bf16.mxu1 %v1726_v41 }
  0x68   :  { %941 = vmatpush1.bf16.msra.mxu0 %v1721_v42  ;;  %984 = vmatpush1.bf16.msra.mxu1 %v1724_v43 }
  0x69   :  { %942 = vmatprep.subr.bf16.mxu0 %v1729_v44  ;;  %985 = vmatprep.subr.bf16.mxu1 %v1732_v45 }
  0x6c   :  { %943 = vmatpush2.bf16.msra.mxu0 %v1727_v46  ;;  %986 = vmatpush2.bf16.msra.mxu1 %v1730_v47 }
  0x6d   :  { %944 = vmatprep.subr.bf16.mxu0 %v1735_v48  ;;  %987 = vmatprep.subr.bf16.mxu1 %v1738_v49 }
  0x70   :  { %945 = vmatpush2.bf16.msra.mxu0 %v1733_v50  ;;  %988 = vmatpush2.bf16.msra.mxu1 %v1736_v51  ;;  %v1777_v51 = vld [vmem:[#allocation8 + $0xb0] ss:$12 sps:$4 sm:$0xff]  }
  0x71   :  { %946 = vmatprep.subr.bf16.mxu0 %v1741_v52  ;;  %989 = vmatprep.subr.bf16.mxu1 %v1744_v53  ;;  %v1778_v52 = vld [vmem:[#allocation8 + $0x230] ss:$12 sps:$4 sm:$0xff]  }
  0x74   :  { %947 = vmatpush2.bf16.msra.mxu0 %v1739_v54  ;;  %990 = vmatpush2.bf16.msra.mxu1 %v1742_v55  ;;  %v1779_v55 = vld [vmem:[#allocation8 + $0x158] ss:$12 sps:$4 sm:$0xff]  }
  0x75   :  { %948 = vmatprep.subr.bf16.mxu0 %v1747_v56  ;;  %991 = vmatprep.subr.bf16.mxu1 %v1750_v57  ;;  %v1780_v56 = vld [vmem:[#allocation8 + $0x2d8] ss:$12 sps:$4 sm:$0xff]  }
  0x76   :  { %v1781_v57 = vld [vmem:[#allocation8 + $0x98] ss:$12 sps:$4 sm:$0xff]  }
  0x78   :  { %949 = vmatpush2.bf16.msra.mxu0 %v1745_v58  ;;  %992 = vmatpush2.bf16.msra.mxu1 %v1748_v59  ;;  %v1782_v58 = vld [vmem:[#allocation8 + $0x218] ss:$12 sps:$4 sm:$0xff]   ;;  %v1783_v59 = vld [vmem:[#allocation8 + $0x140] ss:$12 sps:$4 sm:$0xff]  }
  0x79   :  { %950 = vmatprep.subr.bf16.mxu0 %v1753_v60  ;;  %993 = vmatprep.subr.bf16.mxu1 %v1756_v61  ;;  %v1784_v60 = vld [vmem:[#allocation8 + $0x2c0] ss:$12 sps:$4 sm:$0xff]  }
  0x7a   :  { %v1785_v61 = vld [vmem:[#allocation8 + $0x80] ss:$12 sps:$4 sm:$0xff]  }
  0x7c   :  { %951 = vmatpush2.bf16.msra.mxu0 %v1751_v62  ;;  %994 = vmatpush2.bf16.msra.mxu1 %v1754_v63  ;;  %v1786_v62 = vld [vmem:[#allocation8 + $0x200] ss:$12 sps:$4 sm:$0xff]   ;;  %v1787_v63 = vld [vmem:[#allocation8 + $0x128] ss:$12 sps:$4 sm:$0xff]  }
  0x7d   :  { %952 = vmatprep.subr.bf16.mxu0 %v1759_v0  ;;  %995 = vmatprep.subr.bf16.mxu1 %v1762_v1  ;;  %v1788_v0 = vld [vmem:[#allocation8 + $0x2a8] ss:$12 sps:$4 sm:$0xff]  }
  0x7e   :  { %v1789_v1 = vld [vmem:[#allocation8 + $0x68] ss:$12 sps:$4 sm:$0xff]  }
  0x80   :  { %953 = vmatpush2.bf16.msra.mxu0 %v1757_v2  ;;  %996 = vmatpush2.bf16.msra.mxu1 %v1760_v3  ;;  %v1790_v2 = vld [vmem:[#allocation8 + $0x1e8] ss:$12 sps:$4 sm:$0xff]   ;;  %v1791_v3 = vld [vmem:[#allocation8 + $0x110] ss:$12 sps:$4 sm:$0xff]  }
  0x81   :  { %954 = vmatprep.subr.bf16.mxu0 %v1765_v4  ;;  %997 = vmatprep.subr.bf16.mxu1 %v1768_v5  ;;  %v1792_v4 = vld [vmem:[#allocation8 + $0x290] ss:$12 sps:$4 sm:$0xff]  }
  0x82   :  { %v1793_v5 = vld [vmem:[#allocation8 + $0x50] ss:$12 sps:$4 sm:$0xff]  }
  0x84   :  { %955 = vmatpush2.bf16.msra.mxu0 %v1763_v6  ;;  %998 = vmatpush2.bf16.msra.mxu1 %v1766_v7  ;;  %v1794_v6 = vld [vmem:[#allocation8 + $0x1d0] ss:$12 sps:$4 sm:$0xff]   ;;  %v1795_v7 = vld [vmem:[#allocation8 + $0xf8] ss:$12 sps:$4 sm:$0xff]  }
  0x85   :  { %956 = vmatprep.subr.bf16.mxu0 %v1771_v8  ;;  %999 = vmatprep.subr.bf16.mxu1 %v1774_v9  ;;  %v1796_v8 = vld [vmem:[#allocation8 + $0x278] ss:$12 sps:$4 sm:$0xff]  }
  0x86   :  { %v1797_v9 = vld [vmem:[#allocation8 + $0x38] ss:$12 sps:$4 sm:$0xff]  }
  0x88   :  { %957 = vmatpush2.bf16.msra.mxu0 %v1769_v10  ;;  %1000 = vmatpush2.bf16.msra.mxu1 %v1772_v11  ;;  %v1798_v10 = vld [vmem:[#allocation8 + $0x1b8] ss:$12 sps:$4 sm:$0xff]   ;;  %v1799_v11 = vld [vmem:[#allocation8 + $0xe0] ss:$12 sps:$4 sm:$0xff]  }
  0x89   :  { %1555 = vmatprep.subr.bf16.mxu0 %v1775_v12  ;;  %1577 = vmatprep.subr.bf16.mxu1 %v1776_v13  ;;  %v1800_v12 = vld [vmem:[#allocation8 + $0x260] ss:$12 sps:$4 sm:$0xff]  }
  0x8a   :  { %v1801_v13 = vld [vmem:[#allocation8 + $0x20] ss:$12 sps:$4 sm:$0xff]  }
 0x10b   :  { %v205_v21 = vpop.f32.mrf.mxu0  ;;  %v248_v22 = vpop.f32.mrf.mxu1 }
 0x10c   :  { %v206_v35 = vadd.f32 %v205_v21, %v110_v25  ;;  %v249_v36 = vadd.f32 %v248_v22, %v118_v26  ;;  %v1805_v21 = vld [vmem:[#allocation8 + $0x8] ss:$12 sps:$4 sm:$0xff]  }
 0x10d   :  { %v207_v27 = vpop.f32.mrf.mxu0  ;;  %v250_v28 = vpop.f32.mrf.mxu1  ;;  %v1806_v22 = vld [vmem:[#allocation8 + $0x188] ss:$12 sps:$4 sm:$0xff]  }
 0x10e   :  { %v208_v31 = vadd.f32 %v207_v27, %v114_v23  ;;  %v251_v32 = vadd.f32 %v250_v28, %v122_v24  ;;  %v257_v47 = vmax.f32 %v206_v35, 0.0  ;;  %v259_v48 = vmax.f32 %v249_v36, 0.0  ;;  %v1811_v27 = vld [vmem:[#allocation10 + $0x68] sm:$0xff]  }
 0x10f   :  { %v209_v29 = vpop.f32.mrf.mxu0  ;;  %v252_v30 = vpop.f32.mrf.mxu1  ;;  %v1812_v28 = vld [vmem:[#allocation10 + $0x28] sm:$0xff]  }
 0x110   :  { %v210_v33 = vadd.f32 %v209_v29, %v110_v25  ;;  %v253_v34 = vadd.f32 %v252_v30, %v118_v26  ;;  %v258_v43 = vmax.f32 %v208_v31, 0.0  ;;  %v260_v44 = vmax.f32 %v251_v32, 0.0  ;;  %v1809_v25 = vld [vmem:[#allocation10 + $0x70] sm:$0xff]   ;;  %v1813_v29 = vld [vmem:[#allocation10 + $0x60] sm:$0xff]   ;;  %v1815_v31 = vld [vmem:[#allocation10 + $0x58] sm:$0xff]  }
 0x111   :  { %v211_v37 = vpop.f32.mrf.mxu0  ;;  %v254_v38 = vpop.f32.mrf.mxu1  ;;  %v1810_v26 = vld [vmem:[#allocation10 + $0x30] sm:$0xff]   ;;  %v1814_v30 = vld [vmem:[#allocation10 + $0x20] sm:$0xff]   ;;  %v1816_v32 = vld [vmem:[#allocation10 + $0x18] sm:$0xff]  }
 0x112   :  { %v212_v39 = vadd.f32 %v211_v37, %v114_v23  ;;  %v255_v40 = vadd.f32 %v254_v38, %v122_v24  ;;  %v261_v41 = vmax.f32 %v210_v33, 0.0  ;;  %v263_v42 = vmax.f32 %v253_v34, 0.0  ;;  %v1807_v23 = vld [vmem:[#allocation10 + $0x78] sm:$0xff]   ;;  %v1817_v33 = vld [vmem:[#allocation10 + $0x50] sm:$0xff]   ;;  %v1819_v35 = vld [vmem:[#allocation10 + $0x48] sm:$0xff]  }
 0x113   :  { %v1808_v24 = vld [vmem:[#allocation10 + $0x38] sm:$0xff]   ;;  %v1818_v34 = vld [vmem:[#allocation10 + $0x10] sm:$0xff]   ;;  %v1820_v36 = vld [vmem:[#allocation10 + $0x8] sm:$0xff]  }
 0x114   :  { %v262_v45 = vmax.f32 %v212_v39, 0.0  ;;  %v264_v46 = vmax.f32 %v255_v40, 0.0  ;;  %v2050_v53 = vpack.c.bf16 %v261_v41, %v257_v47  ;;  %v2052_v54 = vpack.c.bf16 %v263_v42, %v259_v48  ;;  %v1821_v37 = vld [vmem:[#allocation10 + $0x40] sm:$0xff]   ;;  %v1823_v39 = vld [vmem:[#allocation10 + $0xb8] sm:$0xff]   ;;  %v1824_v41 = vld [vmem:[#allocation10 + $0xb0] sm:$0xff]  }
 0x115   :  { %v1822_v38 = vld [vmem:[#allocation10] sm:$0xff]   ;;  %v1977_v40 = vmov 0.0   ;;  %v1825_v42 = vld [vmem:[#allocation10 + $0xa8] sm:$0xff]  }
 0x116   :  { %v266_v49 = vpack.c.bf16 %v262_v45, %v258_v43  ;;  %v268_v50 = vpack.c.bf16 %v264_v46, %v260_v44  ;;  %v1826_v43 = vld [vmem:[#allocation10 + $0xa0] sm:$0xff]   ;;  %v1827_v44 = vld [vmem:[#allocation10 + $0x98] sm:$0xff]   ;;  %v1828_v45 = vld [vmem:[#allocation10 + $0x90] sm:$0xff]  }
 0x117   :  { %v1829_v46 = vld [vmem:[#allocation10 + $0x88] sm:$0xff]   ;;  %v1830_v47 = vld [vmem:[#allocation10 + $0x80] sm:$0xff]  }
 0x118   :  { %958 = vmatprep.mubr.bf16.mxu0 %v266_v49  ;;  %1001 = vmatprep.mubr.bf16.mxu1 %v268_v50  ;;  %v397_v48 = vld [vmem:[%s2080_s4] sm:$0x7] }
 0x119   :  { %959 = vmatmul.mubr.bf16.vlgmr.msra.gmra.mxu0 %v2050_v53  ;;  %1002 = vmatmul.mubr.bf16.vlgmr.msra.gmra.mxu1 %v2052_v54 }
 0x11a   :  { %1556 = vmatpush3.bf16.msra.mxu0 %v1777_v51  ;;  %1578 = vmatpush3.bf16.msra.mxu1 %v1778_v52 }
 0x11b   :  { %1044 = vmatprep.mubr.bf16.mxu0 %v266_v49  ;;  %1085 = vmatprep.mubr.bf16.mxu1 %v268_v50  ;;  %v406_v49 = vrot.slane %v397_v48, %v113_v16  ;;  %v402_v50 = vrot.slane %v397_v48, %v109_v18 }
 0x11c   :  { %1557 = vmatprep.subr.bf16.mxu0 %v1779_v55  ;;  %1579 = vmatprep.subr.bf16.mxu1 %v1780_v56 }
 0x11e   :  { %1558 = vmatpush3.bf16.msra.mxu0 %v1781_v57  ;;  %1580 = vmatpush3.bf16.msra.mxu1 %v1782_v58 }
 0x11f   :  { %1559 = vmatprep.subr.bf16.mxu0 %v1783_v59  ;;  %1581 = vmatprep.subr.bf16.mxu1 %v1784_v60 }
 0x122   :  { %1560 = vmatpush3.bf16.msra.mxu0 %v1785_v61  ;;  %1582 = vmatpush3.bf16.msra.mxu1 %v1786_v62 }
 0x123   :  { %1561 = vmatprep.subr.bf16.mxu0 %v1787_v63  ;;  %1583 = vmatprep.subr.bf16.mxu1 %v1788_v0 }
 0x126   :  { %1562 = vmatpush3.bf16.msra.mxu0 %v1789_v1  ;;  %1584 = vmatpush3.bf16.msra.mxu1 %v1790_v2 }
 0x127   :  { %1563 = vmatprep.subr.bf16.mxu0 %v1791_v3  ;;  %1585 = vmatprep.subr.bf16.mxu1 %v1792_v4 }
 0x12a   :  { %1564 = vmatpush3.bf16.msra.mxu0 %v1793_v5  ;;  %1586 = vmatpush3.bf16.msra.mxu1 %v1794_v6 }
 0x12b   :  { %1565 = vmatprep.subr.bf16.mxu0 %v1795_v7  ;;  %1587 = vmatprep.subr.bf16.mxu1 %v1796_v8 }
 0x12e   :  { %1566 = vmatpush3.bf16.msra.mxu0 %v1797_v9  ;;  %1588 = vmatpush3.bf16.msra.mxu1 %v1798_v10  ;;  %v410_v9 = vrot.slane %v397_v48, %v117_v19 }
 0x12f   :  { %1567 = vmatprep.subr.bf16.mxu0 %v1799_v11  ;;  %1589 = vmatprep.subr.bf16.mxu1 %v1800_v12 }
 0x132   :  { %1568 = vmatpush3.bf16.msra.mxu0 %v1801_v13  ;;  %1590 = vmatpush3.bf16.msra.mxu1 %v1802_v14 }
 0x133   :  { %1569 = vmatprep.subr.bf16.mxu0 %v1803_v17  ;;  %1591 = vmatprep.subr.bf16.mxu1 %v1804_v20 }
 0x136   :  { %1570 = vmatpush3.bf16.msra.mxu0 %v1805_v21  ;;  %1592 = vmatpush3.bf16.msra.mxu1 %v1806_v22 }
 0x137   :  { %1599 = vmatprep.subr.bf16.mxu0 %v1807_v23  ;;  %1630 = vmatprep.subr.bf16.mxu1 %v1977_v40 }
 0x139   :  { %1045 = vmatmul.mubr.bf16.vlgmr.msra.gmra.mxu0 %v2050_v53  ;;  %1086 = vmatmul.mubr.bf16.vlgmr.msra.gmra.mxu1 %v2052_v54 }
 0x13a   :  { %1600 = vmatpush3.bf16.msra.mxu0 %v1808_v24  ;;  %1631 = vmatpush3.bf16.msra.mxu1 %v1823_v39 }
 0x13b   :  { %1601 = vmatprep.subr.bf16.mxu0 %v1809_v25  ;;  %1632 = vmatprep.subr.bf16.mxu1 %v1977_v40 }
 0x13c   :  { %1646 = vmatprep.mubr.msk.bf16.mxu1 %vm1978_vm1, %v1977_v40 }
 0x13e   :  { %1602 = vmatpush3.bf16.msra.mxu0 %v1810_v26  ;;  %1633 = vmatpush3.bf16.msra.mxu1 %v1824_v41 }
 0x13f   :  { %1603 = vmatprep.subr.bf16.mxu0 %v1811_v27  ;;  %1634 = vmatprep.subr.bf16.mxu1 %v1977_v40 }
 0x142   :  { %1604 = vmatpush3.bf16.msra.mxu0 %v1812_v28  ;;  %1635 = vmatpush3.bf16.msra.mxu1 %v1825_v42 }
 0x143   :  { %1605 = vmatprep.subr.bf16.mxu0 %v1813_v29  ;;  %1636 = vmatprep.subr.bf16.mxu1 %v1977_v40 }
 0x146   :  { %1606 = vmatpush3.bf16.msra.mxu0 %v1814_v30  ;;  %1637 = vmatpush3.bf16.msra.mxu1 %v1826_v43 }
 0x147   :  { %1607 = vmatprep.subr.bf16.mxu0 %v1815_v31  ;;  %1638 = vmatprep.subr.bf16.mxu1 %v1977_v40 }
 0x14a   :  { %1608 = vmatpush3.bf16.msra.mxu0 %v1816_v32  ;;  %1639 = vmatpush3.bf16.msra.mxu1 %v1827_v44 }
 0x14b   :  { %1609 = vmatprep.subr.bf16.mxu0 %v1817_v33  ;;  %1640 = vmatprep.subr.bf16.mxu1 %v1977_v40 }
 0x14e   :  { %1610 = vmatpush3.bf16.msra.mxu0 %v1818_v34  ;;  %1641 = vmatpush3.bf16.msra.mxu1 %v1828_v45  ;;  %v1521_v34 = vld [vmem:[%s2082_s6] ss:$0 sm:$0xff] }
 0x14f   :  { %1611 = vmatprep.subr.bf16.mxu0 %v1819_v35  ;;  %1642 = vmatprep.subr.bf16.mxu1 %v1977_v40 }
 0x152   :  { %1612 = vmatpush3.bf16.msra.mxu0 %v1820_v36  ;;  %1643 = vmatpush3.bf16.msra.mxu1 %v1829_v46 }
 0x153   :  { %1613 = vmatprep.subr.bf16.mxu0 %v1821_v37  ;;  %1644 = vmatprep.subr.bf16.mxu1 %v1977_v40 }
 0x156   :  { %1614 = vmatpush3.bf16.msra.mxu0 %v1822_v38  ;;  %1645 = vmatpush3.bf16.msra.mxu1 %v1830_v47 }
 0x1d9   :  { %v960_v51 = vpop.f32.mrf.mxu0  ;;  %v1003_v52 = vpop.f32.mrf.mxu1 }
 0x1da   :  { %v961_v56 = vadd.f32 %v960_v51, %v402_v50 }
 0x1db   :  { %v962_v53 = vpop.f32.mrf.mxu0  ;;  %v1005_v54 = vpop.f32.mrf.mxu1 }
 0x1dc   :  { %v963_v55 = vadd.f32 %v962_v53, %v406_v49  ;;  %v1004_v0 = vadd.f32 %v1003_v52, %v961_v56 }
 0x1dd   :  { %v964_v57 = vpop.f32.mrf.mxu0  ;;  %v1007_v58 = vpop.f32.mrf.mxu1 }
 0x1de   :  { %v965_v59 = vadd.f32 %v964_v57, %v402_v50  ;;  %v1006_v61 = vadd.f32 %v1005_v54, %v963_v55  ;;  %v1094_v18 = vmax.f32 %v1004_v0, 0.0 }
 0x1df   :  { %v966_v60 = vpop.f32.mrf.mxu0  ;;  %v1009_v1 = vpop.f32.mrf.mxu1 }
 0x1e0   :  { %v1008_v62 = vadd.f32 %v1007_v58, %v965_v59  ;;  %v967_v63 = vadd.f32 %v966_v60, %v406_v49  ;;  %v1095_v3 = vmax.f32 %v1006_v61, 0.0 }
 0x1e2   :  { %v1010_v2 = vadd.f32 %v1009_v1, %v967_v63  ;;  %v1097_v16 = vmax.f32 %v1008_v62, 0.0 }
 0x1e4   :  { %v1098_v4 = vmax.f32 %v1010_v2, 0.0  ;;  %v1100_v6 = vpack.c.bf16 %v1097_v16, %v1094_v18 }
 0x1e6   :  { %v1101_v5 = vpack.c.bf16 %v1098_v4, %v1095_v3 }
 0x1e8   :  { %1334 = vmatprep.mubr.bf16.mxu0 %v1101_v5 }
 0x1e9   :  { %1335 = vmatmul.mubr.bf16.vlgmr.msra.gmra.mxu0 %v1100_v6 }
 0x1f9   :  { %v1571_v7 = vpop.f32.mrf.mxu0  ;;  %v1593_v8 = vpop.f32.mrf.mxu1 }
 0x1fb   :  { %v1572_v10 = vpop.f32.mrf.mxu0  ;;  %v1594_v11 = vpop.f32.mrf.mxu1 }
 0x1fc   :  { %v1573_v12 = vadd.f32 %v1572_v10, %v1571_v7  ;;  %v1595_v22 = vadd.f32 %v1594_v11, %v1593_v8 }
 0x1fd   :  { %v1574_v13 = vpop.f32.mrf.mxu0  ;;  %v1596_v14 = vpop.f32.mrf.mxu1 }
 0x1fe   :  { %v1047_v17 = vadd.f32 %v1573_v12, %v410_v9 }
 0x1ff   :  { %v1575_v20 = vpop.f32.mrf.mxu0  ;;  %v1597_v21 = vpop.f32.mrf.mxu1 }
 0x200   :  { %v1576_v23 = vadd.f32 %v1575_v20, %v1574_v13  ;;  %v1088_v24 = vadd.f32 %v1595_v22, %v1047_v17  ;;  %v1598_v26 = vadd.f32 %v1597_v21, %v1596_v14 }
 0x202   :  { %v1050_v25 = vadd.f32 %v1576_v23, %v410_v9  ;;  %v1096_v28 = vmax.f32 %v1088_v24, 0.0 }
 0x204   :  { %v1091_v27 = vadd.f32 %v1598_v26, %v1050_v25 }
 0x206   :  { %v1099_v29 = vmax.f32 %v1091_v27, 0.0 }
 0x208   :  { %v1102_v30 = vpack.c.bf16 %v1099_v29, %v1096_v28 }
 0x20a   :  { %1647 = vmatmul.mubr.bf16.vlgmr.msra.gmra.mxu1 %v1102_v30 }
 0x2a9   :  { %v1615_v15 = vpop.f32.mrf.mxu0 }
 0x2ab   :  { %v1616_v19 = vpop.f32.mrf.mxu0 }
 0x2ac   :  { %v1617_v32 = vadd.f32 %v1616_v19, %v1615_v15 }
 0x2ad   :  { %v1618_v31 = vpop.f32.mrf.mxu0 }
 0x2ae   :  { %v1337_v36 = vadd.f32 %v1617_v32, %v1521_v34 }
 0x2af   :  { %v1619_v33 = vpop.f32.mrf.mxu0 }
 0x2b0   :  { %v1620_v35 = vadd.f32 %v1619_v33, %v1618_v31 }
 0x2b2   :  { %v1340_v40 = vadd.f32 %v1620_v35, %v1521_v34 }
 0x2ca   :  { %v1377_v37 = vpop.f32.mrf.mxu1 }
 0x2cb   :  { %v1378_v38 = vadd.f32 %v1377_v37, %v1337_v36 }
 0x2cc   :  { %v1648_v39 = vpop.f32.mrf.mxu1 }
 0x2cd   :  { %1831 = vtanh.f32 %v1378_v38 }
 0x2ce   :  { %v1380_v41 = vpop.f32.mrf.mxu1 }
 0x2cf   :  { %v1381_v42 = vadd.f32 %v1380_v41, %v1340_v40 }
 0x2d0   :  { %v1649_v43 = vpop.f32.mrf.mxu1 }
 0x2d1   :  { %1833 = vtanh.f32 %v1381_v42 }
 0x2da   :  { %v1832_v44 = vpop.eup %1831 }
 0x2de   :  { %v1834_v45 = vpop.eup %1833 }
 0x2df   :  { %v1553_v46 = vpack.c.bf16 %v1834_v45, %v1832_v44 }
 0x2e1   :  { %1554 = vst [vmem:[#allocation11] sm:$0xff] %v1553_v46  }
 0x2e2   :  { %1946 = shalt.err (!%p1943_p1)
}
 0x2e3   :  { %1407 = dma.vmem_to_hbm [thread:$0]  %s1402_s10, 128, %s2083_s7, [#allocation4], %s1974_s0, %s1974_s0, %s1975_s28  }
 0x2e4   :  { %1961 = dma.done.wait [#allocation4], 128  }
 0x2e5   :  { %1962 = vsyncadd [#allocation4], 4294967168 }
 0x2e6   :  { %1411 = vsyncpa [#allocation3], 1 }
 0x2e7   :  { %1412 = vsyncpa [#allocation6], 1 }
 0x2e8   :  { %1413 = vsyncpa [#allocation9], 1 }
 0x2e9   :  { %1414 = vsyncpa [#allocation4], 1 }

</bundles_post_ra>
